<compile_context>
chip_gen: v6e
topology: v6e:2x2x1
jax: 0.10.0
libtpu: 0.0.40
codegen_flags: <defaults>
</compile_context>

<pallas_src>
import functools

import jax
import jax.numpy as jnp
from jax.experimental import pallas as pl
from jax.experimental.pallas import tpu as pltpu


_LANE = 128
_VMEM_TILE_BUDGET = 8 * 1024 * 1024   # bytes per (in+out) buffer set; ~2x when double-buffered
_MAX_ROW_TILE = 2048                  # rows per grid step, upper cap
_MIN_PALLAS_ELEMS = 64 * 1024         # below this, a single fused XLA max is faster


def _sublane_multiple(dtype) -> int:
    # Sublane packing granularity: f32 -> 8, bf16/f16 -> 16, int8/fp8 -> 32.
    itemsize = jnp.dtype(dtype).itemsize
    return {4: 8, 2: 16, 1: 32}.get(itemsize, 8)


def _splitmax_kernel(x_ref, o_ref, *, split):
    # x_ref: (tr, 2*split) contiguous tile; split is a multiple of 128, so the
    # two half-slices are lane-aligned vreg views (no data movement).
    x = x_ref[...]
    o_ref[...] = jnp.maximum(x[:, :split], x[:, split:])


def _ref_split_max(x, split_size):
    # Pure-JAX reference mirroring the PyTorch code path exactly.
    first = x[..., :split_size]
    second = x[..., split_size:]
    return jnp.max(jnp.stack((first, second), axis=x.ndim), axis=x.ndim)


def split_max(x: jax.Array, split_size: int, *, use_pallas=None) -> jax.Array:
    """Pallas implementation of SplitMax.forward.

    Accepts 2-D [B, 2*S] or 3-D [B, T, 2*S] inputs and returns [..., S].
    `use_pallas=None` auto-dispatches (jnp fallback for tiny inputs or when
    S is not a multiple of 128); True/False forces the path.
    """
    if x.ndim not in (2, 3):
        raise ValueError("SplitMax expects a 2-D or 3-D input")
    S = split_size
    if x.shape[-1] != 2 * S:
        raise ValueError(
            f"last dim ({x.shape[-1]}) must equal 2*splitSize ({2 * S}) "
            "for the stack+max to be well-formed"
        )

    lead_shape = x.shape[:-1]
    rows = 1
    for d in lead_shape:
        rows *= d

    lane_aligned = (S % _LANE == 0)
    small = rows * S < _MIN_PALLAS_ELEMS
    if use_pallas is None:
        use_pallas = lane_aligned and not small
    if use_pallas and not lane_aligned:
        # TODO(synk): pad the feature dim to a multiple of 128 with -inf to
        # keep the Pallas path for non-lane-aligned split sizes.
        use_pallas = False
    if not use_pallas:
        return _ref_split_max(x, S)

    itemsize = jnp.dtype(x.dtype).itemsize
    sub = _sublane_multiple(x.dtype)

    # Row tile: largest multiple of the sublane granularity such that one
    # input block (tr, 2*S) + one output block (tr, S) fits the budget.
    bytes_per_row = 3 * S * itemsize
    tr_max = max(sub, (_VMEM_TILE_BUDGET // bytes_per_row) // sub * sub)
    tr_max = min(tr_max, _MAX_ROW_TILE)

    rows_aligned = ((rows + sub - 1) // sub) * sub
    tr = min(tr_max, rows_aligned)
    rows_padded = ((rows + tr - 1) // tr) * tr
    grid = (rows_padded // tr,)

    x2 = x.reshape(rows, 2 * S)
    if rows_padded != rows:
        x2 = jnp.pad(x2, ((0, rows_padded - rows), (0, 0)))

    out2 = pl.pallas_call(
        functools.partial(_splitmax_kernel, split=S),
        out_shape=jax.ShapeDtypeStruct((rows_padded, S), x.dtype),
        grid_spec=pltpu.PrefetchScalarGridSpec(
            num_scalar_prefetch=0,
            grid=grid,
            in_specs=[pl.BlockSpec((tr, 2 * S), lambda i: (i, 0))],
            out_specs=pl.BlockSpec((tr, S), lambda i: (i, 0)),
        ),
        compiler_params=pltpu.CompilerParams(
            dimension_semantics=("parallel",),
            # ~16 MiB double-buffered worst case; 32 MiB is safe on v5e/v6e
            # (128 MiB physical) and within v7x's 64 MiB physical VMEM.
            vmem_limit_bytes=32 * 1024 * 1024,
        ),
    )(x2)

    if rows_padded != rows:
        out2 = out2[:rows]
    return out2.reshape(*lead_shape, S)


if __name__ == "__main__":
    key = jax.random.PRNGKey(0)
    k1, k2, k3, k4 = jax.random.split(key, 4)

    S = 128  # splitSize (lane-aligned)

    # 3-D case: [B, T, 2*S] — small shape, force the Pallas path.
    x3 = jax.random.normal(k1, (2, 8, 2 * S), dtype=jnp.float32)
    y3 = jax.block_until_ready(split_max(x3, S, use_pallas=True))
    assert y3.shape == (2, 8, S)
    assert jnp.allclose(y3, _ref_split_max(x3, S))

    # 2-D case: [B, 2*S] — small shape, force the Pallas path.
    x2 = jax.random.normal(k2, (16, 2 * S), dtype=jnp.float32)
    y2 = jax.block_until_ready(split_max(x2, S, use_pallas=True))
    assert y2.shape == (16, S)
    assert jnp.allclose(y2, _ref_split_max(x2, S))

    # Non-divisible row count (exercises row padding + unpadding).
    x_odd = jax.random.normal(k3, (2, 13, 2 * S), dtype=jnp.float32)
    y_odd = jax.block_until_ready(split_max(x_odd, S, use_pallas=True))
    assert y_odd.shape == (2, 13, S)
    assert jnp.allclose(y_odd, _ref_split_max(x_odd, S))

    # Auto-dispatch path (large enough to clear the Pallas threshold).
    x_big = jax.random.normal(k4, (512, 2 * S), dtype=jnp.float32)
    y_big = jax.block_until_ready(split_max(x_big, S))
    assert y_big.shape == (512, S)
    assert jnp.allclose(y_big, _ref_split_max(x_big, S))

    print("KERNEL_OK")
</pallas_src>

<mosaic_0001>
module attributes {stable_mosaic.version = 11 : i64} {
  func.func @_splitmax_kernel(%arg0: i32, %arg1: memref<16x256xf32, #tpu.memory_space<vmem>>, %arg2: memref<16x128xf32, #tpu.memory_space<vmem>>) attributes {dimension_semantics = [#tpu.dimension_semantics<parallel>], iteration_bounds = array<i64: 1>, scalar_prefetch = 0 : i64, scratch_operands = 0 : i64, tpu.core_type = #tpu.core_type<tc>, window_params = [{transform_indices = @transform_0, window_bounds = array<i64: 16, 256>}, {transform_indices = @transform_1, window_bounds = array<i64: 16, 128>}]} {
    %c0 = arith.constant 0 : index
    %c0_0 = arith.constant 0 : index
    %0 = vector.load %arg1[%c0, %c0_0] : memref<16x256xf32, #tpu.memory_space<vmem>>, vector<16x256xf32>
    %1 = vector.extract_strided_slice %0 {offsets = [0, 0], sizes = [16, 128], strides = [1, 1]} : vector<16x256xf32> to vector<16x128xf32>
    %2 = vector.extract_strided_slice %0 {offsets = [0, 128], sizes = [16, 128], strides = [1, 1]} : vector<16x256xf32> to vector<16x128xf32>
    %3 = arith.maximumf %1, %2 : vector<16x128xf32>
    %c0_1 = arith.constant 0 : index
    %c0_2 = arith.constant 0 : index
    %4 = vector.load %arg2[%c0_1, %c0_2] : memref<16x128xf32, #tpu.memory_space<vmem>>, vector<16x128xf32>
    tpu.vector_store %arg2[%c0_1, %c0_2], %3 {strides = array<i32>} : memref<16x128xf32, #tpu.memory_space<vmem>>, vector<16x128xf32>,
    return
  }
  func.func @transform_0(%arg0: i32) -> (i32, i32) {
    %c0_i32 = arith.constant 0 : i32
    %c0_i32_0 = arith.constant 0 : i32
    return %arg0, %c0_i32 : i32, i32
  }
  func.func @transform_1(%arg0: i32) -> (i32, i32) {
    %c0_i32 = arith.constant 0 : i32
    %c0_i32_0 = arith.constant 0 : i32
    return %arg0, %c0_i32 : i32, i32
  }
}

</mosaic_0001>

<bundles_post_ra>
// kernel: tpu_custom_call.1
= control target key start
LH: loop header
LB: loop body
LE: loop exit
PB: predicated region body
PF: predicated region fallthrough
CT: control target
= control target key end

     0   :  { %6 = vsyncpa [#allocation3], 0  ;;  %s120_s0 = inlined_call_operand.hbm [shape: f32[16,256], index: 0, kind: input, shape index: {}]   ;;  %s121_s1 = inlined_call_operand.hbm [shape: f32[16,128], index: 1, kind: output, shape index: {}]  }
   0x1   :  { %7 = vsyncpa [#allocation4], 0  ;;  %s98_s6 = smov [#allocation2]  }
   0x2   :  { %s13_s7 = sshll.u32 %s98_s6, 4  ;;  %s14_s7 = int_to_ptr.vmem [resolvable:$true] %s13_s7 }
   0x3   :  { %s62_s8 = scalar_lea.vmem %s14_s7, 512  ;;  %p67_p1 = scmp.lt.s32.totalorder %s14_s7, %s14_s7 }
   0x4   :  { %p63_p0 = scmp.ne.s32.totalorder %s14_s7, %s62_s8  ;;  %p68_p2 = scmp.lt.s32.totalorder %s62_s8, %s62_s8 }
   0x6   :  { %p69_p3 = por %p68_p2, %p67_p1 }
   0x8   :  { %p70_p4 = pnand %p69_p3, %p63_p0 }
   0xa   :  { %73 = shalt.err (!%p70_p4)
}
   0xb   :  { %s99_s9 = smov 256   ;;  %s100_s10 = smov 16  }
   0xc   :  { %19 = dma.hbm_to_vmem [thread:$0]  %s120_s0, 512, %s14_s7, [#allocation3], %s99_s9, %s99_s9, %s100_s10  }
   0xd   :  { %94 = dma.done.wait [#allocation3], 512  }
   0xe   :  { %95 = vsyncadd [#allocation3], 4294966784  ;;  %s101_s13 = smov [#allocation5]   ;;  %v23_v0 = vld [vmem:[#allocation2] sm:$0xff]  ;;  %v24_v1 = vld [vmem:[#allocation2 + $0x8] sm:$0xff] }
   0xf   :  { %s36_s14 = sshll.u32 %s101_s13, 4  ;;  %v25_v2 = vld [vmem:[#allocation2 + $0x10] sm:$0xff]  ;;  %v27_v3 = vmax.f32 %v23_v0, %v24_v1  ;;  %v26_v4 = vld [vmem:[#allocation2 + $0x18] sm:$0xff]  ;;  %s37_s14 = int_to_ptr.vmem [resolvable:$true] %s36_s14 }
  0x10   :  { %v28_v5 = vmax.f32 %v25_v2, %v26_v4  ;;  %s74_s15 = scalar_lea.vmem %s37_s14, 256  ;;  %p79_p6 = scmp.lt.s32.totalorder %s37_s14, %s37_s14 }
  0x11   :  { %29 = vst [vmem:[#allocation5] sm:$0xff] %v27_v3  ;;  %p75_p5 = scmp.ne.s32.totalorder %s37_s14, %s74_s15  ;;  %p80_p7 = scmp.lt.s32.totalorder %s74_s15, %s74_s15 }
  0x12   :  { %30 = vst [vmem:[#allocation5 + $0x8] sm:$0xff] %v28_v5 }
  0x13   :  { %p81_p8 = por %p80_p7, %p79_p6 }
  0x15   :  { %p82_p9 = pnand %p81_p8, %p75_p5 }
  0x17   :  { %85 = shalt.err (!%p82_p9)
}
  0x18   :  { %s102_s0 = smov 128   ;;  %s103_s16 = smov 8  }
  0x19   :  { %42 = dma.vmem_to_hbm [thread:$0]  %s37_s14, 256, %s121_s1, [#allocation4], %s102_s0, %s102_s0, %s103_s16  }
  0x1a   :  { %96 = dma.done.wait [#allocation4], 256  }
  0x1b   :  { %97 = vsyncadd [#allocation4], 4294967040 }
  0x1c   :  { %46 = vsyncpa [#allocation3], 1 }
  0x1d   :  { %47 = vsyncpa [#allocation4], 1 }

</bundles_post_ra>
